<compile_context>
chip_gen: v6e
topology: v6e:2x2x1
jax: 0.10.0
libtpu: 0.0.40
codegen_flags: <defaults>
</compile_context>

<pallas_src>
import functools

import jax
import jax.numpy as jnp
from jax.experimental import pallas as pl
from jax.experimental.pallas import tpu as pltpu


def _round_up(n, m):
    return ((n + m - 1) // m) * m


def _mlp_kernel(x_ref,
                w1_ref, b1_ref,
                w2_ref, b2_ref,
                w3_ref, b3_ref,
                w4_ref, b4_ref,
                o_ref):
    # In-kernel cast to bf16 (rides a free VPU slot; avoids a wrapper-side
    # HBM read+write pass over x).
    x = x_ref[...].astype(jnp.bfloat16)
    # Layer 1: Linear (bf16 x bf16 -> f32 acc) + bias + ReLU, back to bf16.
    h = jnp.dot(x, w1_ref[...], preferred_element_type=jnp.float32)
    h = jnp.maximum(h + b1_ref[...], 0.0).astype(jnp.bfloat16)
    # Layer 2
    h = jnp.dot(h, w2_ref[...], preferred_element_type=jnp.float32)
    h = jnp.maximum(h + b2_ref[...], 0.0).astype(jnp.bfloat16)
    # Layer 3
    h = jnp.dot(h, w3_ref[...], preferred_element_type=jnp.float32)
    h = jnp.maximum(h + b3_ref[...], 0.0).astype(jnp.bfloat16)
    # Layer 4: Linear only (no activation); unpadded f32 store.
    h = jnp.dot(h, w4_ref[...], preferred_element_type=jnp.float32)
    o_ref[...] = (h + b4_ref[...]).astype(o_ref.dtype)


def prep_params(params):
    """One-time param prep (hoisted out of the per-call path):
    transpose weights to [in, out] and cast to bf16; reshape biases to
    [1, out] and keep them f32 for the f32 bias-add.  No output padding."""
    return dict(
        w1t=params["w1"].T.astype(jnp.bfloat16),
        w2t=params["w2"].T.astype(jnp.bfloat16),
        w3t=params["w3"].T.astype(jnp.bfloat16),
        w4t=params["w4"].T.astype(jnp.bfloat16),
        b1=params["b1"].reshape(1, -1).astype(jnp.float32),
        b2=params["b2"].reshape(1, -1).astype(jnp.float32),
        b3=params["b3"].reshape(1, -1).astype(jnp.float32),
        b4=params["b4"].reshape(1, -1).astype(jnp.float32),
    )


def _pick_tile_b(b, tile_b):
    """Batch tile: multiple of 16 (bf16 sublane packing), clamped to the batch,
    and capped so large batches give >= 4 grid steps (v7x: both TCs busy)."""
    sub = 16 if b >= 16 else 8
    tile_b = max(sub, min(int(tile_b), _round_up(b, sub)))
    tile_b = _round_up(tile_b, sub)
    min_steps = 4
    if b >= min_steps * 128:
        cap = _round_up(-(-b // min_steps), sub)   # ceil(b / min_steps)
        tile_b = min(tile_b, cap)
    return tile_b


def _mlp_pallas(x, prepped, tile_b):
    b, d_in = x.shape
    d_out = prepped["w4t"].shape[1]
    grid = (pl.cdiv(b, tile_b),)   # ragged last block: stores are masked

    x_spec = pl.BlockSpec((tile_b, d_in), lambda i: (i, 0))
    out_spec = pl.BlockSpec((tile_b, d_out), lambda i: (i, 0))
    # Weights/biases: constant block index -> resident in VMEM, single buffer.
    resident = lambda a: pl.BlockSpec(a.shape, lambda i: (0, 0),
                                      pipeline_mode=pl.Buffered(1))

    return pl.pallas_call(
        _mlp_kernel,
        out_shape=jax.ShapeDtypeStruct((b, d_out), jnp.float32),
        grid=grid,
        in_specs=[x_spec,
                  resident(prepped["w1t"]), resident(prepped["b1"]),
                  resident(prepped["w2t"]), resident(prepped["b2"]),
                  resident(prepped["w3t"]), resident(prepped["b3"]),
                  resident(prepped["w4t"]), resident(prepped["b4"])],
        out_specs=out_spec,
        # Default scoped VMEM limit is ample (few MiB footprint even at
        # tile_b = 8192), so no manual vmem_limit_bytes.
        compiler_params=pltpu.CompilerParams(
            dimension_semantics=("parallel",)),
    )(x,
      prepped["w1t"], prepped["b1"],
      prepped["w2t"], prepped["b2"],
      prepped["w3t"], prepped["b3"],
      prepped["w4t"], prepped["b4"])


@functools.partial(jax.jit, static_argnames=("tile_b",))
def mlp_forward(x, prepped, tile_b=4096):
    """x: [B, D_in] float32. prepped: output of prep_params. Returns [B, D_out] f32."""
    b = x.shape[0]
    tb = _pick_tile_b(b, tile_b)
    return _mlp_pallas(x, prepped, tb)


def init_params(key, D_in, H1, H2, H3, D_out):
    """Deterministic init mimicking nn.Linear's U(-1/sqrt(fan_in), 1/sqrt(fan_in))."""
    dims = [(H1, D_in), (H2, H1), (H3, H2), (D_out, H3)]
    params = {}
    for i, (out_f, in_f) in enumerate(dims, start=1):
        key, kw, kb = jax.random.split(key, 3)
        bound = 1.0 / jnp.sqrt(in_f)
        params[f"w{i}"] = jax.random.uniform(
            kw, (out_f, in_f), jnp.float32, minval=-bound, maxval=bound)
        params[f"b{i}"] = jax.random.uniform(
            kb, (out_f,), jnp.float32, minval=-bound, maxval=bound)
    return params


def reference_forward(x, params):
    """Matches the kernel's numerics: bf16 operands, f32 accumulation/bias/ReLU."""
    def layer(h, w, b, relu):
        y = jnp.dot(h.astype(jnp.bfloat16), w.T.astype(jnp.bfloat16),
                    preferred_element_type=jnp.float32) + b.astype(jnp.float32)
        return jnp.maximum(y, 0.0) if relu else y
    h = layer(x, params["w1"], params["b1"], True)
    h = layer(h, params["w2"], params["b2"], True)
    h = layer(h, params["w3"], params["b3"], True)
    return layer(h, params["w4"], params["b4"], False)


if __name__ == "__main__":
    # Small shapes consistent with the module: Net(D_in, H1, H2, H3, D_out).
    B, D_in, H1, H2, H3, D_out = 8, 32, 64, 64, 32, 16

    key = jax.random.PRNGKey(0)
    key, kx = jax.random.split(key)
    x = jax.random.normal(kx, (B, D_in), jnp.float32)

    # Matches the source's literal operator precedence: x - (min / (max - min)).
    # TODO(synk): the original script almost certainly intended min-max
    # normalization (x - min) / (max - min); keeping literal semantics here.
    x = x - jnp.min(x) / (jnp.max(x) - jnp.min(x))

    params = init_params(key, D_in, H1, H2, H3, D_out)
    prepped = prep_params(params)   # one-time transpose/cast

    y = jax.block_until_ready(mlp_forward(x, prepped))
    y_ref = reference_forward(x, params)
    assert y.shape == (B, D_out)
    assert jnp.allclose(y, y_ref, atol=1e-2, rtol=1e-2), "mismatch vs reference"

    # Second run exercising a ragged multi-step batch grid (cdiv grid + masked
    # last-block store) with resident weights.
    key, kx2 = jax.random.split(key)
    x2 = jax.random.normal(kx2, (60, D_in), jnp.float32)  # not a tile multiple
    y2 = jax.block_until_ready(mlp_forward(x2, prepped, tile_b=16))
    y2_ref = reference_forward(x2, params)
    assert y2.shape == (60, D_out)
    assert jnp.allclose(y2, y2_ref, atol=1e-2, rtol=1e-2), "mismatch vs reference (tiled)"

    print("KERNEL_OK")
</pallas_src>

<mosaic_0001>
module attributes {stable_mosaic.version = 11 : i64} {
  func.func @_mlp_kernel(%arg0: i32, %arg1: memref<8x32xf32, #tpu.memory_space<vmem>>, %arg2: memref<32x64xbf16, #tpu.memory_space<vmem>>, %arg3: memref<1x64xf32, #tpu.memory_space<vmem>>, %arg4: memref<64x64xbf16, #tpu.memory_space<vmem>>, %arg5: memref<1x64xf32, #tpu.memory_space<vmem>>, %arg6: memref<64x32xbf16, #tpu.memory_space<vmem>>, %arg7: memref<1x32xf32, #tpu.memory_space<vmem>>, %arg8: memref<32x16xbf16, #tpu.memory_space<vmem>>, %arg9: memref<1x16xf32, #tpu.memory_space<vmem>>, %arg10: memref<8x16xf32, #tpu.memory_space<vmem>>) attributes {dimension_semantics = [#tpu.dimension_semantics<parallel>], iteration_bounds = array<i64: 1>, scalar_prefetch = 0 : i64, scratch_operands = 0 : i64, tpu.core_type = #tpu.core_type<tc>, window_params = [{transform_indices = @transform_0, window_bounds = array<i64: 8, 32>}, {pipeline_mode = #tpu.pipeline_mode<synchronous>, transform_indices = @transform_1, window_bounds = array<i64: 32, 64>}, {pipeline_mode = #tpu.pipeline_mode<synchronous>, transform_indices = @transform_2, window_bounds = array<i64: 1, 64>}, {pipeline_mode = #tpu.pipeline_mode<synchronous>, transform_indices = @transform_3, window_bounds = array<i64: 64, 64>}, {pipeline_mode = #tpu.pipeline_mode<synchronous>, transform_indices = @transform_4, window_bounds = array<i64: 1, 64>}, {pipeline_mode = #tpu.pipeline_mode<synchronous>, transform_indices = @transform_5, window_bounds = array<i64: 64, 32>}, {pipeline_mode = #tpu.pipeline_mode<synchronous>, transform_indices = @transform_6, window_bounds = array<i64: 1, 32>}, {pipeline_mode = #tpu.pipeline_mode<synchronous>, transform_indices = @transform_7, window_bounds = array<i64: 32, 16>}, {pipeline_mode = #tpu.pipeline_mode<synchronous>, transform_indices = @transform_8, window_bounds = array<i64: 1, 16>}, {transform_indices = @transform_9, window_bounds = array<i64: 8, 16>}]} {
    %c0 = arith.constant 0 : index
    %c0_0 = arith.constant 0 : index
    %0 = vector.load %arg1[%c0, %c0_0] : memref<8x32xf32, #tpu.memory_space<vmem>>, vector<8x32xf32>
    %1 = arith.truncf %0 : vector<8x32xf32> to vector<8x32xbf16>
    %c0_1 = arith.constant 0 : index
    %c0_2 = arith.constant 0 : index
    %2 = vector.load %arg2[%c0_1, %c0_2] : memref<32x64xbf16, #tpu.memory_space<vmem>>, vector<32x64xbf16>
    %cst = arith.constant dense<0.000000e+00> : vector<8x64xf32>
    %3 = tpu.matmul %1, %2, %cst {dimension_numbers = #tpu.dot_dimension_numbers<[1], [0], [0], [1], [0, 0, 1, 1], [], []>} : vector<8x32xbf16>, vector<32x64xbf16>, vector<8x64xf32> -> vector<8x64xf32>
    %c0_3 = arith.constant 0 : index
    %c0_4 = arith.constant 0 : index
    %4 = vector.load %arg3[%c0_3, %c0_4] : memref<1x64xf32, #tpu.memory_space<vmem>>, vector<1x64xf32>
    %5 = vector.broadcast %4 : vector<1x64xf32> to vector<8x64xf32>
    %6 = arith.addf %3, %5 : vector<8x64xf32>
    %cst_5 = arith.constant 0.000000e+00 : f32
    %7 = vector.broadcast %cst_5 : f32 to vector<8x64xf32>
    %8 = arith.maximumf %6, %7 : vector<8x64xf32>
    %9 = arith.truncf %8 : vector<8x64xf32> to vector<8x64xbf16>
    %c0_6 = arith.constant 0 : index
    %c0_7 = arith.constant 0 : index
    %10 = vector.load %arg4[%c0_6, %c0_7] : memref<64x64xbf16, #tpu.memory_space<vmem>>, vector<64x64xbf16>
    %cst_8 = arith.constant dense<0.000000e+00> : vector<8x64xf32>
    %11 = tpu.matmul %9, %10, %cst_8 {dimension_numbers = #tpu.dot_dimension_numbers<[1], [0], [0], [1], [0, 0, 1, 1], [], []>} : vector<8x64xbf16>, vector<64x64xbf16>, vector<8x64xf32> -> vector<8x64xf32>
    %c0_9 = arith.constant 0 : index
    %c0_10 = arith.constant 0 : index
    %12 = vector.load %arg5[%c0_9, %c0_10] : memref<1x64xf32, #tpu.memory_space<vmem>>, vector<1x64xf32>
    %13 = vector.broadcast %12 : vector<1x64xf32> to vector<8x64xf32>
    %14 = arith.addf %11, %13 : vector<8x64xf32>
    %cst_11 = arith.constant 0.000000e+00 : f32
    %15 = vector.broadcast %cst_11 : f32 to vector<8x64xf32>
    %16 = arith.maximumf %14, %15 : vector<8x64xf32>
    %17 = arith.truncf %16 : vector<8x64xf32> to vector<8x64xbf16>
    %c0_12 = arith.constant 0 : index
    %c0_13 = arith.constant 0 : index
    %18 = vector.load %arg6[%c0_12, %c0_13] : memref<64x32xbf16, #tpu.memory_space<vmem>>, vector<64x32xbf16>
    %cst_14 = arith.constant dense<0.000000e+00> : vector<8x32xf32>
    %19 = tpu.matmul %17, %18, %cst_14 {dimension_numbers = #tpu.dot_dimension_numbers<[1], [0], [0], [1], [0, 0, 1, 1], [], []>} : vector<8x64xbf16>, vector<64x32xbf16>, vector<8x32xf32> -> vector<8x32xf32>
    %c0_15 = arith.constant 0 : index
    %c0_16 = arith.constant 0 : index
    %20 = vector.load %arg7[%c0_15, %c0_16] : memref<1x32xf32, #tpu.memory_space<vmem>>, vector<1x32xf32>
    %21 = vector.broadcast %20 : vector<1x32xf32> to vector<8x32xf32>
    %22 = arith.addf %19, %21 : vector<8x32xf32>
    %cst_17 = arith.constant 0.000000e+00 : f32
    %23 = vector.broadcast %cst_17 : f32 to vector<8x32xf32>
    %24 = arith.maximumf %22, %23 : vector<8x32xf32>
    %25 = arith.truncf %24 : vector<8x32xf32> to vector<8x32xbf16>
    %c0_18 = arith.constant 0 : index
    %c0_19 = arith.constant 0 : index
    %26 = vector.load %arg8[%c0_18, %c0_19] : memref<32x16xbf16, #tpu.memory_space<vmem>>, vector<32x16xbf16>
    %cst_20 = arith.constant dense<0.000000e+00> : vector<8x16xf32>
    %27 = tpu.matmul %25, %26, %cst_20 {dimension_numbers = #tpu.dot_dimension_numbers<[1], [0], [0], [1], [0, 0, 1, 1], [], []>} : vector<8x32xbf16>, vector<32x16xbf16>, vector<8x16xf32> -> vector<8x16xf32>
    %c0_21 = arith.constant 0 : index
    %c0_22 = arith.constant 0 : index
    %28 = vector.load %arg9[%c0_21, %c0_22] : memref<1x16xf32, #tpu.memory_space<vmem>>, vector<1x16xf32>
    %29 = vector.broadcast %28 : vector<1x16xf32> to vector<8x16xf32>
    %30 = arith.addf %27, %29 : vector<8x16xf32>
    %c0_23 = arith.constant 0 : index
    %c0_24 = arith.constant 0 : index
    %31 = vector.load %arg10[%c0_23, %c0_24] : memref<8x16xf32, #tpu.memory_space<vmem>>, vector<8x16xf32>
    tpu.vector_store %arg10[%c0_23, %c0_24], %30 {strides = array<i32>} : memref<8x16xf32, #tpu.memory_space<vmem>>, vector<8x16xf32>,
    return
  }
  func.func @transform_0(%arg0: i32) -> (i32, i32) {
    %c0_i32 = arith.constant 0 : i32
    %c0_i32_0 = arith.constant 0 : i32
    return %arg0, %c0_i32 : i32, i32
  }
  func.func @transform_1(%arg0: i32) -> (i32, i32) {
    %c0_i32 = arith.constant 0 : i32
    %c0_i32_0 = arith.constant 0 : i32
    %c0_i32_1 = arith.constant 0 : i32
    return %c0_i32, %c0_i32_0 : i32, i32
  }
  func.func @transform_2(%arg0: i32) -> (i32, i32) {
    %c0_i32 = arith.constant 0 : i32
    %c0_i32_0 = arith.constant 0 : i32
    %c0_i32_1 = arith.constant 0 : i32
    return %c0_i32, %c0_i32_0 : i32, i32
  }
  func.func @transform_3(%arg0: i32) -> (i32, i32) {
    %c0_i32 = arith.constant 0 : i32
    %c0_i32_0 = arith.constant 0 : i32
    %c0_i32_1 = arith.constant 0 : i32
    return %c0_i32, %c0_i32_0 : i32, i32
  }
  func.func @transform_4(%arg0: i32) -> (i32, i32) {
    %c0_i32 = arith.constant 0 : i32
    %c0_i32_0 = arith.constant 0 : i32
    %c0_i32_1 = arith.constant 0 : i32
    return %c0_i32, %c0_i32_0 : i32, i32
  }
  func.func @transform_5(%arg0: i32) -> (i32, i32) {
    %c0_i32 = arith.constant 0 : i32
    %c0_i32_0 = arith.constant 0 : i32
    %c0_i32_1 = arith.constant 0 : i32
    return %c0_i32, %c0_i32_0 : i32, i32
  }
  func.func @transform_6(%arg0: i32) -> (i32, i32) {
    %c0_i32 = arith.constant 0 : i32
    %c0_i32_0 = arith.constant 0 : i32
    %c0_i32_1 = arith.constant 0 : i32
    return %c0_i32, %c0_i32_0 : i32, i32
  }
  func.func @transform_7(%arg0: i32) -> (i32, i32) {
    %c0_i32 = arith.constant 0 : i32
    %c0_i32_0 = arith.constant 0 : i32
    %c0_i32_1 = arith.constant 0 : i32
    return %c0_i32, %c0_i32_0 : i32, i32
  }
  func.func @transform_8(%arg0: i32) -> (i32, i32) {
    %c0_i32 = arith.constant 0 : i32
    %c0_i32_0 = arith.constant 0 : i32
    %c0_i32_1 = arith.constant 0 : i32
    return %c0_i32, %c0_i32_0 : i32, i32
  }
  func.func @transform_9(%arg0: i32) -> (i32, i32) {
    %c0_i32 = arith.constant 0 : i32
    %c0_i32_0 = arith.constant 0 : i32
    return %arg0, %c0_i32 : i32, i32
  }
}

</mosaic_0001>

<bundles_post_ra>
// kernel: mlp_forward.1
= control target key start
LH: loop header
LB: loop body
LE: loop exit
PB: predicated region body
PF: predicated region fallthrough
CT: control target
= control target key end

     0   :  { %v469_v1 = vmov 0.0   ;;  %vm470_vm0 = vmmov 0   ;;  %vm59_vm1 = vcmask 261120   ;;  %s584_s0 = inlined_call_operand.vmem [shape: f32[8,32], index: 0, kind: input, shape index: {}]   ;;  %s585_s1 = inlined_call_operand.vmem [shape: bf16[32,64], index: 1, kind: input, shape index: {}]   ;;  %s586_s2 = inlined_call_operand.vmem [shape: f32[1,64], index: 2, kind: input, shape index: {}]   ;;  %s587_s3 = inlined_call_operand.vmem [shape: bf16[64,64], index: 3, kind: input, shape index: {}]   ;;  %s588_s4 = inlined_call_operand.vmem [shape: f32[1,64], index: 4, kind: input, shape index: {}]   ;;  %s589_s5 = inlined_call_operand.vmem [shape: bf16[64,32], index: 5, kind: input, shape index: {}]   ;;  %s590_s6 = inlined_call_operand.vmem [shape: f32[1,32], index: 6, kind: input, shape index: {}]   ;;  %s591_s7 = inlined_call_operand.vmem [shape: bf16[32,16], index: 7, kind: input, shape index: {}]   ;;  %s592_s8 = inlined_call_operand.vmem [shape: f32[1,16], index: 8, kind: input, shape index: {}]   ;;  %s593_s9 = inlined_call_operand.hbm [shape: f32[8,16], index: 9, kind: output, shape index: {}]  }
   0x1   :  { %v435_v0 = vld [vmem:[%s585_s1 + $0x8] sm:$0xff]   ;;  %392 = vmatprep.subr.bf16.mxu0 %v469_v1  ;;  %v436_v2 = vld [vmem:[%s585_s1] sm:$0xff]   ;;  %400 = vmatprep.subr.bf16.mxu1 %v469_v1  ;;  %v437_v4 = vld [vmem:[%s587_s3 + $0x18] sm:$0xff]  }
   0x2   :  { %393 = vmatpush3.bf16.msra.mxu0 %v435_v0  ;;  %396 = vmatprep.mubr.msk.bf16.mxu0 %vm470_vm0, %v469_v1  ;;  %v34_v3 = vld [vmem:[%s584_s0] sm:$0xff]  ;;  %v438_v5 = vld [vmem:[%s587_s3 + $0x10] sm:$0xff]  }
   0x3   :  { %394 = vmatprep.subr.bf16.mxu0 %v469_v1  ;;  %408 = vmatprep.mubr.msk.bf16.mxu1 %vm470_vm0, %v469_v1  ;;  %v35_v6 = vpack.c.bf16 %v34_v3, %v34_v3 }
   0x4   :  { %401 = vmatpush3.bf16.msra.mxu1 %v437_v4 }
   0x5   :  { %402 = vmatprep.subr.bf16.mxu1 %v469_v1 }
   0x6   :  { %395 = vmatpush3.bf16.msra.mxu0 %v436_v2 }
   0x7   :  { %412 = vmatprep.subr.bf16.mxu0 %v469_v1 }
   0x8   :  { %403 = vmatpush3.bf16.msra.mxu1 %v438_v5 }
   0x9   :  { %397 = vmatmul.mubr.msk.bf16.vlgmr.msra.gmra.mxu0 %vm59_vm1, %v35_v6  ;;  %404 = vmatprep.subr.bf16.mxu1 %v469_v1 }
   0xa   :  { %420 = vmatprep.mubr.msk.bf16.mxu0 %vm470_vm0, %v469_v1 }
   0xb   :  { %14 = vsyncpa [#allocation3], 0  ;;  %v439_v7 = vld [vmem:[%s587_s3 + $0x8] sm:$0xff]   ;;  %v440_v8 = vld [vmem:[%s587_s3] sm:$0xff]   ;;  %vm144_vm2 = vcmask 523264   ;;  %s471_s16 = smov [#allocation2]  }
   0xc   :  { %405 = vmatpush3.bf16.msra.mxu1 %v439_v7  ;;  %v441_v9 = vld [vmem:[%s589_s5 + $0x18] sm:$0xff]   ;;  %v442_v10 = vld [vmem:[%s589_s5 + $0x10] sm:$0xff]   ;;  %v356_v11 = vld [vmem:[%s586_s2] ss:$0 sm:$0xff]  ;;  %vm340_vm3 = vcmask 130048  }
   0xd   :  { %406 = vmatprep.subr.bf16.mxu1 %v469_v1  ;;  %413 = vmatpush3.bf16.msra.mxu0 %v441_v9  ;;  %v443_v19 = vld [vmem:[%s589_s5 + $0x8] sm:$0xff]   ;;  %v444_v20 = vld [vmem:[%s589_s5] sm:$0xff]  }
   0xe   :  { %414 = vmatprep.subr.bf16.mxu0 %v469_v1  ;;  %v445_v21 = vld [vmem:[%s591_s7 + $0x8] sm:$0xff]   ;;  %v360_v22 = vld [vmem:[%s588_s4] ss:$0 sm:$0xff] }
   0xf   :  { %v446_v30 = vld [vmem:[%s591_s7] sm:$0xff]   ;;  %s348_s7 = sshll.u32 %s471_s16, 4  ;;  %s349_s7 = int_to_ptr.vmem [resolvable:$true] %s348_s7 }
  0x10   :  { %407 = vmatpush3.bf16.msra.mxu1 %v440_v8  ;;  %v366_v31 = vld [vmem:[%s590_s6] ss:$0 sm:$0xff]  ;;  %s447_s6 = scalar_lea.vmem %s349_s7, 128  ;;  %p452_p1 = scmp.lt.s32.totalorder %s349_s7, %s349_s7 }
  0x11   :  { %424 = vmatprep.subr.bf16.mxu1 %v469_v1  ;;  %415 = vmatpush3.bf16.msra.mxu0 %v442_v10  ;;  %v372_v39 = vld [vmem:[%s592_s8] ss:$0 sm:$0xff]  ;;  %p448_p0 = scmp.ne.s32.totalorder %s349_s7, %s447_s6  ;;  %p453_p2 = scmp.lt.s32.totalorder %s447_s6, %s447_s6 }
  0x12   :  { %416 = vmatprep.subr.bf16.mxu0 %v469_v1 }
  0x13   :  { %p454_p3 = por %p453_p2, %p452_p1 }
  0x15   :  { %417 = vmatpush3.bf16.msra.mxu0 %v443_v19  ;;  %p455_p4 = pnand %p454_p3, %p448_p0 }
  0x16   :  { %418 = vmatprep.subr.bf16.mxu0 %v469_v1 }
  0x19   :  { %419 = vmatpush3.bf16.msra.mxu0 %v444_v20 }
  0xc9   :  { %v97_v12 = vpop.f32.mrf.mxu0 }
  0xca   :  { %v98_v13 = vadd.f32 %v356_v11, %v97_v12 }
  0xcb   :  { %v398_v14 = vpop.f32.mrf.mxu0 }
  0xcc   :  { %v103_v15 = vmax.f32 %v98_v13, 0.0 }
  0xcd   :  { %v100_v16 = vpop.f32.mrf.mxu0 }
  0xce   :  { %v104_v17 = vpack.c.bf16 %v103_v15, %v103_v15 }
  0xcf   :  { %v399_v18 = vpop.f32.mrf.mxu0 }
  0xd0   :  { %409 = vmatmul.mubr.msk.bf16.vlgmr.msra.gmra.mxu1 %vm144_vm2, %v104_v17 }
  0xd1   :  { %428 = vmatprep.mubr.msk.bf16.mxu1 %vm470_vm0, %v469_v1  ;;  %425 = vmatpush3.bf16.msra.mxu1 %v445_v21 }
  0xd2   :  { %426 = vmatprep.subr.bf16.mxu1 %v469_v1 }
  0xd5   :  { %427 = vmatpush3.bf16.msra.mxu1 %v446_v30 }
 0x190   :  { %v182_v23 = vpop.f32.mrf.mxu1 }
 0x191   :  { %v183_v24 = vadd.f32 %v360_v22, %v182_v23 }
 0x192   :  { %v410_v25 = vpop.f32.mrf.mxu1 }
 0x193   :  { %v188_v26 = vmax.f32 %v183_v24, 0.0 }
 0x194   :  { %v185_v27 = vpop.f32.mrf.mxu1 }
 0x195   :  { %v189_v28 = vpack.c.bf16 %v188_v26, %v188_v26 }
 0x196   :  { %v411_v29 = vpop.f32.mrf.mxu1 }
 0x197   :  { %421 = vmatmul.mubr.msk.bf16.vlgmr.msra.gmra.mxu0 %vm144_vm2, %v189_v28 }
 0x257   :  { %v266_v32 = vpop.f32.mrf.mxu0 }
 0x258   :  { %v267_v33 = vadd.f32 %v366_v31, %v266_v32 }
 0x259   :  { %v422_v34 = vpop.f32.mrf.mxu0 }
 0x25a   :  { %v272_v35 = vmax.f32 %v267_v33, 0.0 }
 0x25b   :  { %v269_v36 = vpop.f32.mrf.mxu0 }
 0x25c   :  { %v273_v37 = vpack.c.bf16 %v272_v35, %v272_v35 }
 0x25d   :  { %v423_v38 = vpop.f32.mrf.mxu0 }
 0x25e   :  { %429 = vmatmul.mubr.msk.bf16.vlgmr.msra.gmra.mxu1 %vm59_vm1, %v273_v37 }
 0x31e   :  { %v334_v40 = vpop.f32.mrf.mxu1 }
 0x31f   :  { %v335_v41 = vadd.f32 %v372_v39, %v334_v40 }
 0x320   :  { %v430_v42 = vpop.f32.mrf.mxu1 }
 0x321   :  { %341 = vst.msk [vmem:[#allocation2] sm:$0xff] %vm340_vm3, %v335_v41 }
 0x322   :  { %v337_v43 = vpop.f32.mrf.mxu1 }
 0x323   :  { %458 = shalt.err (!%p455_p4)
}
 0x324   :  { %351 = dma.vmem_to_hbm [thread:$0]  %s349_s7, 128, %s593_s9, [#allocation3]   ;;  %v431_v44 = vpop.f32.mrf.mxu1 }
 0x325   :  { %467 = dma.done.wait [#allocation3], 128  }
 0x326   :  { %468 = vsyncadd [#allocation3], 4294967168 }
 0x327   :  { %355 = vsyncpa [#allocation3], 1 }

</bundles_post_ra>
